<compile_context>
chip_gen: v7x
topology: tpu7x:2x2x1
jax: 0.10.0
libtpu: 0.0.40
codegen_flags: <defaults>
</compile_context>

<pallas_src>
import functools

import jax
import jax.numpy as jnp
import numpy as np
from jax.experimental import pallas as pl
from jax.experimental.pallas import tpu as pltpu


def _regressor_kernel(content_ref, convw_ref, convb_ref, grid_ref, wlin_ref,
                      yt_ref, out_ref, *, B, H, W, K, L):
    """Single-program kernel: batched 1x1 conv + spatial softmax expectation +
    linear + normed-mse, with exactly three MXU matmuls and no VMEM scratch.

    content_ref: (B*C, HW) bf16 VMEM   per-batch channel blocks x flat spatial (lane/MXU-N)
    convw_ref  : (B*K, B*C) bf16 VMEM  block-diagonal 1x1-conv weight
    convb_ref  : (B*K, 1)   f32  VMEM  conv bias, tiled over the batch blocks
    grid_ref   : (HW, 3)    f32  VMEM  [ygrid | xgrid | ones]
    wlin_ref   : (2L, 2K)   f32  VMEM  linear weight, split [y...|x...] ordering both ways
    yt_ref     : (2L, B)    f32  VMEM  targets: rows [y-coords | x-coords], cols = batch
    out_ref    : (1, 1)     f32  SMEM  normed_mse scalar
    """
    # --- 1x1 conv for the whole batch: one MXU matmul + one broadcast bias add ---
    logits = jnp.dot(convw_ref[...], content_ref[...],
                     preferred_element_type=jnp.float32)                 # (B*K, HW) f32
    logits = logits + convb_ref[...]                                     # broadcast over lanes

    # --- spatial softmax expectation over the flattened spatial (lane) axis ---
    m = jnp.max(logits, axis=1, keepdims=True)                           # (B*K, 1)  XLU
    e = jnp.exp(logits - m)                                              # (B*K, HW) EUP
    # sums = [sum(e*yg), sum(e*xg), sum(e)] as one MXU contraction
    sums = jnp.dot(e, grid_ref[...], preferred_element_type=jnp.float32)  # (B*K, 3)
    r = pl.reciprocal(sums[:, 2:3], approx=True)                         # (B*K, 1)  EUP vrcp
    ey = sums[:, 0:1] * (jnp.float32(H) * r)                             # expected y * H
    ex = sums[:, 1:2] * (jnp.float32(W) * r)                             # expected x * W

    # --- assemble the linear input (2K, B) in vregs: no scratch, no masked stores ---
    cols = [jnp.concatenate([ey[b * K:(b + 1) * K, :],
                             ex[b * K:(b + 1) * K, :]], axis=0)          # (2K, 1) per batch
            for b in range(B)]
    u = jnp.concatenate(cols, axis=1)                                    # (2K, B)

    # --- one Linear for the whole batch (bias-free), weights pre-permuted ---
    lmk_t = jnp.dot(wlin_ref[...], u, preferred_element_type=jnp.float32)  # (2L, B)

    # --- dist / inter / mean epilogue, batch on the lane axis ---
    yt = yt_ref[...]                                                     # (2L, B)
    diff = yt - lmk_t
    dy = diff[0:L, :]
    dx = diff[L:2 * L, :]
    dist = jnp.sqrt(dy * dy + dx * dx)                                   # (L, B)
    d0y = yt[0:1, :] - yt[1:2, :]
    d0x = yt[L:L + 1, :] - yt[L + 1:L + 2, :]
    inter = jnp.sqrt(d0y * d0y + d0x * d0x)                              # (1, B)
    normed = dist * pl.reciprocal(inter, approx=True)                    # (L, B)  EUP vrcp
    out_ref[0, 0] = jnp.sum(normed) * jnp.float32(1.0 / (B * L))


def regressor_forward_pallas(content_nchw, conv_w, conv_b, lin_w, y):
    """content_nchw: (B, C, H, W); conv_w: (K, C, 1, 1); conv_b: (K,);
    lin_w: (2L, 2K) torch Linear layout; y: (B, L, 2).  Returns scalar normed_mse."""
    B, C, H, W = content_nchw.shape
    K = conv_w.shape[0]
    L = y.shape[1]
    HW = H * W

    # --- glue: layout plumbing of small params (plain JAX), no content copies beyond
    # the bf16 cast (production: the encoder emits bf16 directly).
    content_flat = content_nchw.reshape(B * C, HW).astype(jnp.bfloat16)   # (B*C, HW)

    wk = conv_w[:, :, 0, 0].astype(jnp.float32)                           # (K, C)
    convw_bd = jnp.kron(jnp.eye(B, dtype=jnp.float32), wk).astype(jnp.bfloat16)  # (B*K, B*C)
    convb_col = jnp.tile(conv_b.reshape(K, 1).astype(jnp.float32), (B, 1))       # (B*K, 1)

    # packed spatial grid: p = h*W + w (row-major), columns [ygrid | xgrid | ones]
    ys = np.linspace(0.0, 1.0, H, dtype=np.float32)
    xs = np.linspace(0.0, 1.0, W, dtype=np.float32)
    grid_g = jnp.asarray(
        np.stack([np.repeat(ys, W), np.tile(xs, H), np.ones(HW, np.float32)],
                 axis=1), jnp.float32)                                    # (HW, 3)

    # permute the Linear weight from interleaved [y0,x0,...] input / [Y0,X0,...]
    # output ordering to split [y...|x...] ordering on both sides.
    in_perm = np.concatenate([np.arange(0, 2 * K, 2), np.arange(1, 2 * K, 2)])
    out_perm = np.concatenate([np.arange(0, 2 * L, 2), np.arange(1, 2 * L, 2)])
    wlin_split = lin_w[out_perm][:, in_perm].astype(jnp.float32)          # (2L, 2K)

    # targets packed as (2L, B): rows [y-coords per landmark | x-coords per landmark]
    yt = jnp.concatenate([y[:, :, 0], y[:, :, 1]], axis=1).T.astype(jnp.float32)  # (2L, B)

    # advisory cost estimate so XLA schedules this tiny latency-bound call sensibly
    flops = 2 * B * K * C * HW + 2 * B * K * 3 * HW + 2 * B * (2 * L) * (2 * K)
    transcendentals = B * K * HW + B * K + B
    bytes_accessed = (B * C * HW * 2 + (B * K) * (B * C) * 2 + B * K * 4
                      + HW * 3 * 4 + (2 * L) * (2 * K) * 4 + 2 * L * B * 4 + 4)

    out = pl.pallas_call(
        functools.partial(_regressor_kernel, B=B, H=H, W=W, K=K, L=L),
        out_shape=jax.ShapeDtypeStruct((1, 1), jnp.float32),
        in_specs=[pl.BlockSpec(memory_space=pltpu.MemorySpace.VMEM)] * 6,
        out_specs=pl.BlockSpec(memory_space=pltpu.MemorySpace.SMEM),
        cost_estimate=pl.CostEstimate(flops=flops,
                                      transcendentals=transcendentals,
                                      bytes_accessed=bytes_accessed),
    )(content_flat, convw_bd, convb_col, grid_g, wlin_split, yt)
    return out[0, 0]


def encoder_apply(images, enc_w, enc_b):
    """Frozen stand-in for the external cnt_encoder (plain JAX glue)."""
    out = jax.lax.conv_general_dilated(
        images, enc_w, window_strides=(2, 2), padding="VALID",
        dimension_numbers=("NCHW", "OIHW", "NCHW"))
    out = out + enc_b[None, :, None, None]
    return jax.nn.relu(out)


def reference_forward(content_nchw, conv_w, conv_b, lin_w, y):
    """Pure-JAX reference mirroring the PyTorch forward (f32, interleaved layout)."""
    B, C, H, W = content_nchw.shape
    K = conv_w.shape[0]
    L = y.shape[1]
    logits = jnp.einsum("bchw,kc->bkhw", content_nchw, conv_w[:, :, 0, 0]) \
        + conv_b[None, :, None, None]
    p = jax.nn.softmax(logits.reshape(B, K, H * W), axis=-1).reshape(B, K, H, W)
    ys = jnp.linspace(0.0, 1.0, H, dtype=jnp.float32)
    xs = jnp.linspace(0.0, 1.0, W, dtype=jnp.float32)
    ey = jnp.sum(p.sum(axis=3) * ys[None, None, :], axis=-1)          # (B, K)
    ex = jnp.sum(p.sum(axis=2) * xs[None, None, :], axis=-1)          # (B, K)
    coords = jnp.stack([ey, ex], axis=-1)                             # (B, K, 2)
    ulmk = (coords * jnp.array([H, W], jnp.float32)).reshape(B, -1)   # (B, 2K)
    lmk = ulmk @ lin_w.T                                              # (B, 2L)
    yp = lmk.reshape(B, L, 2)
    inter = jnp.sqrt(jnp.sum((y[:, 0, :] - y[:, 1, :]) ** 2, -1))
    dist = jnp.sqrt(jnp.sum((y - yp) ** 2, -1))
    return jnp.mean(dist / inter[:, None])


if __name__ == "__main__":
    key = jax.random.PRNGKey(0)
    B, Cin, Himg, Wimg = 2, 3, 32, 32      # small synthetic image size
    C = 8                                  # encoder content channels
    K = 10                                 # config['unsup_landmarks']
    L = 5                                  # num_landmarks (forward reshapes to (-1, 5, 2))

    k1, k2, k3, k4, k5, k6, k7 = jax.random.split(key, 7)
    enc_w = 0.1 * jax.random.normal(k1, (C, Cin, 2, 2), jnp.float32)   # frozen stand-in encoder
    enc_b = 0.1 * jax.random.normal(k2, (C,), jnp.float32)
    conv_w = 0.1 * jax.random.normal(k3, (K, C, 1, 1), jnp.float32)    # nn.Conv2d(c, K, 1)
    conv_b = 0.1 * jax.random.normal(k4, (K,), jnp.float32)
    lin_w = 0.1 * jax.random.normal(k5, (2 * L, 2 * K), jnp.float32)   # nn.Linear(2K, 2L, bias=False)

    images = jax.random.uniform(k6, (B, Cin, Himg, Wimg), jnp.float32)
    H, W = Himg // 2, Wimg // 2
    y = jax.random.uniform(k7, (B, L, 2), jnp.float32) * jnp.array([H, W], jnp.float32)

    content = encoder_apply(images, enc_w, enc_b)                      # (B, C, 16, 16)

    out = regressor_forward_pallas(content, conv_w, conv_b, lin_w, y)
    out = jax.block_until_ready(out)

    # tolerance loosened vs. a pure-f32 kernel: the content activation (the dominant
    # input) is fed to the MXU in bf16, and both reciprocals use the approx EUP path.
    ref = reference_forward(content, conv_w, conv_b, lin_w, y)
    np.testing.assert_allclose(np.asarray(out), np.asarray(ref), rtol=2e-2, atol=1e-3)
    print("KERNEL_OK")
</pallas_src>

<mosaic_0001>
module attributes {stable_mosaic.version = 11 : i64} {
  func.func @_regressor_kernel(%arg0: memref<16x256xbf16, #tpu.memory_space<vmem>>, %arg1: memref<20x16xbf16, #tpu.memory_space<vmem>>, %arg2: memref<20x1xf32, #tpu.memory_space<vmem>>, %arg3: memref<256x3xf32, #tpu.memory_space<vmem>>, %arg4: memref<10x20xf32, #tpu.memory_space<vmem>>, %arg5: memref<10x2xf32, #tpu.memory_space<vmem>>, %arg6: memref<1x1xf32, #tpu.memory_space<smem>>) attributes {dimension_semantics = [], scalar_prefetch = 0 : i64, scratch_operands = 0 : i64, tpu.core_type = #tpu.core_type<tc>} {
    %c0 = arith.constant 0 : index
    %c0_0 = arith.constant 0 : index
    %0 = vector.load %arg1[%c0, %c0_0] : memref<20x16xbf16, #tpu.memory_space<vmem>>, vector<20x16xbf16>
    %c0_1 = arith.constant 0 : index
    %c0_2 = arith.constant 0 : index
    %1 = vector.load %arg0[%c0_1, %c0_2] : memref<16x256xbf16, #tpu.memory_space<vmem>>, vector<16x256xbf16>
    %cst = arith.constant dense<0.000000e+00> : vector<20x256xf32>
    %2 = tpu.matmul %0, %1, %cst {dimension_numbers = #tpu.dot_dimension_numbers<[1], [0], [0], [1], [0, 0, 1, 1], [], []>} : vector<20x16xbf16>, vector<16x256xbf16>, vector<20x256xf32> -> vector<20x256xf32>
    %c0_3 = arith.constant 0 : index
    %c0_4 = arith.constant 0 : index
    %3 = vector.load %arg2[%c0_3, %c0_4] : memref<20x1xf32, #tpu.memory_space<vmem>>, vector<20x1xf32>
    %4 = vector.broadcast %3 : vector<20x1xf32> to vector<20x256xf32>
    %5 = arith.addf %2, %4 : vector<20x256xf32>
    %cst_5 = arith.constant dense<0xFF800000> : vector<20xf32>
    %6 = vector.multi_reduction <maximumf>, %5, %cst_5 [1] : vector<20x256xf32> to vector<20xf32>
    %7 = vector.shape_cast %6 : vector<20xf32> to vector<20x1xf32>
    %8 = vector.broadcast %7 : vector<20x1xf32> to vector<20x256xf32>
    %9 = arith.subf %5, %8 : vector<20x256xf32>
    %10 = math.exp %9 : vector<20x256xf32>
    %c0_6 = arith.constant 0 : index
    %c0_7 = arith.constant 0 : index
    %11 = vector.load %arg3[%c0_6, %c0_7] : memref<256x3xf32, #tpu.memory_space<vmem>>, vector<256x3xf32>
    %cst_8 = arith.constant dense<0.000000e+00> : vector<20x3xf32>
    %12 = tpu.matmul %10, %11, %cst_8 {dimension_numbers = #tpu.dot_dimension_numbers<[1], [0], [0], [1], [0, 0, 1, 1], [], []>} : vector<20x256xf32>, vector<256x3xf32>, vector<20x3xf32> -> vector<20x3xf32>
    %13 = vector.extract_strided_slice %12 {offsets = [0, 2], sizes = [20, 1], strides = [1, 1]} : vector<20x3xf32> to vector<20x1xf32>
    %14 = tpu.reciprocal %13 {approx = true} : vector<20x1xf32> -> vector<20x1xf32>
    %15 = vector.extract_strided_slice %12 {offsets = [0, 0], sizes = [20, 1], strides = [1, 1]} : vector<20x3xf32> to vector<20x1xf32>
    %cst_9 = arith.constant 1.600000e+01 : f32
    %16 = vector.broadcast %cst_9 : f32 to vector<20x1xf32>
    %17 = arith.mulf %16, %14 : vector<20x1xf32>
    %18 = arith.mulf %15, %17 : vector<20x1xf32>
    %19 = vector.extract_strided_slice %12 {offsets = [0, 1], sizes = [20, 1], strides = [1, 1]} : vector<20x3xf32> to vector<20x1xf32>
    %cst_10 = arith.constant 1.600000e+01 : f32
    %20 = vector.broadcast %cst_10 : f32 to vector<20x1xf32>
    %21 = arith.mulf %20, %14 : vector<20x1xf32>
    %22 = arith.mulf %19, %21 : vector<20x1xf32>
    %23 = vector.extract_strided_slice %18 {offsets = [0, 0], sizes = [10, 1], strides = [1, 1]} : vector<20x1xf32> to vector<10x1xf32>
    %24 = vector.extract_strided_slice %22 {offsets = [0, 0], sizes = [10, 1], strides = [1, 1]} : vector<20x1xf32> to vector<10x1xf32>
    %25 = tpu.concatenate %23, %24 in 0 : vector<10x1xf32>, vector<10x1xf32> -> vector<20x1xf32>
    %26 = vector.extract_strided_slice %18 {offsets = [10, 0], sizes = [10, 1], strides = [1, 1]} : vector<20x1xf32> to vector<10x1xf32>
    %27 = vector.extract_strided_slice %22 {offsets = [10, 0], sizes = [10, 1], strides = [1, 1]} : vector<20x1xf32> to vector<10x1xf32>
    %28 = tpu.concatenate %26, %27 in 0 : vector<10x1xf32>, vector<10x1xf32> -> vector<20x1xf32>
    %29 = tpu.concatenate %25, %28 in 1 : vector<20x1xf32>, vector<20x1xf32> -> vector<20x2xf32>
    %c0_11 = arith.constant 0 : index
    %c0_12 = arith.constant 0 : index
    %30 = vector.load %arg4[%c0_11, %c0_12] : memref<10x20xf32, #tpu.memory_space<vmem>>, vector<10x20xf32>
    %cst_13 = arith.constant dense<0.000000e+00> : vector<10x2xf32>
    %31 = tpu.matmul %30, %29, %cst_13 {dimension_numbers = #tpu.dot_dimension_numbers<[1], [0], [0], [1], [0, 0, 1, 1], [], []>} : vector<10x20xf32>, vector<20x2xf32>, vector<10x2xf32> -> vector<10x2xf32>
    %c0_14 = arith.constant 0 : index
    %c0_15 = arith.constant 0 : index
    %32 = vector.load %arg5[%c0_14, %c0_15] : memref<10x2xf32, #tpu.memory_space<vmem>>, vector<10x2xf32>
    %33 = arith.subf %32, %31 : vector<10x2xf32>
    %34 = vector.extract_strided_slice %33 {offsets = [0, 0], sizes = [5, 2], strides = [1, 1]} : vector<10x2xf32> to vector<5x2xf32>
    %35 = vector.extract_strided_slice %33 {offsets = [5, 0], sizes = [5, 2], strides = [1, 1]} : vector<10x2xf32> to vector<5x2xf32>
    %36 = arith.mulf %34, %34 : vector<5x2xf32>
    %37 = arith.mulf %35, %35 : vector<5x2xf32>
    %38 = arith.addf %36, %37 : vector<5x2xf32>
    %39 = math.sqrt %38 : vector<5x2xf32>
    %40 = vector.extract_strided_slice %32 {offsets = [0, 0], sizes = [1, 2], strides = [1, 1]} : vector<10x2xf32> to vector<1x2xf32>
    %41 = vector.extract_strided_slice %32 {offsets = [1, 0], sizes = [1, 2], strides = [1, 1]} : vector<10x2xf32> to vector<1x2xf32>
    %42 = arith.subf %40, %41 : vector<1x2xf32>
    %43 = vector.extract_strided_slice %32 {offsets = [5, 0], sizes = [1, 2], strides = [1, 1]} : vector<10x2xf32> to vector<1x2xf32>
    %44 = vector.extract_strided_slice %32 {offsets = [6, 0], sizes = [1, 2], strides = [1, 1]} : vector<10x2xf32> to vector<1x2xf32>
    %45 = arith.subf %43, %44 : vector<1x2xf32>
    %46 = arith.mulf %42, %42 : vector<1x2xf32>
    %47 = arith.mulf %45, %45 : vector<1x2xf32>
    %48 = arith.addf %46, %47 : vector<1x2xf32>
    %49 = math.sqrt %48 : vector<1x2xf32>
    %50 = tpu.reciprocal %49 {approx = true} : vector<1x2xf32> -> vector<1x2xf32>
    %51 = vector.broadcast %50 : vector<1x2xf32> to vector<5x2xf32>
    %52 = arith.mulf %39, %51 : vector<5x2xf32>
    %53 = vector.shape_cast %52 : vector<5x2xf32> to vector<1x5x2xf32>
    %cst_16 = arith.constant dense<0.000000e+00> : vector<1xf32>
    %54 = vector.multi_reduction <add>, %53, %cst_16 [1, 2] : vector<1x5x2xf32> to vector<1xf32>
    %55 = vector.shape_cast %54 : vector<1xf32> to vector<1x1x1xf32>
    %56 = vector.extract %55[0, 0, 0] : f32 from vector<1x1x1xf32>
    %cst_17 = arith.constant 1.000000e-01 : f32
    %57 = arith.mulf %56, %cst_17 : f32
    %c0_18 = arith.constant 0 : index
    %c0_19 = arith.constant 0 : index
    %58 = memref.load %arg6[%c0_18, %c0_19] : memref<1x1xf32, #tpu.memory_space<smem>>
    memref.store %57, %arg6[%c0_18, %c0_19] : memref<1x1xf32, #tpu.memory_space<smem>>
    return
  }
}

</mosaic_0001>

<bundles_post_ra>
// kernel: tpu_custom_call.1
= control target key start
LH: loop header
LB: loop body
LE: loop exit
PB: predicated region body
PF: predicated region fallthrough
CT: control target
= control target key end

     0   :  { %v652_v2 = vmov 0   ;;  %vm66_vm0 = vcmask 130048   ;;  %s842_s0 = inlined_call_operand.vmem [shape: bf16[16,256], index: 0, kind: input, shape index: {}]   ;;  %s843_s1 = inlined_call_operand.vmem [shape: bf16[20,16], index: 1, kind: input, shape index: {}]   ;;  %s844_s2 = inlined_call_operand.vmem [shape: f32[20,1], index: 2, kind: input, shape index: {}]   ;;  %s845_s3 = inlined_call_operand.vmem [shape: f32[256,3], index: 3, kind: input, shape index: {}]   ;;  %s846_s4 = inlined_call_operand.vmem [shape: f32[10,20], index: 4, kind: input, shape index: {}]   ;;  %s847_s5 = inlined_call_operand.vmem [shape: f32[10,2], index: 5, kind: input, shape index: {}]   ;;  %s848_s6 = inlined_call_operand.hbm [shape: f32[1,1], index: 6, kind: output, shape index: {}]  }
   0x1   :  { %v611_v0 = vld [vmem:[%s842_s0 + $0x4] ss:$8 sps:$4 sm:$0xff]   ;;  %v613_v1 = vld [vmem:[%s842_s0] ss:$8 sps:$4 sm:$0xff]   ;;  %105 = vmatprep.mubr.bf16.mxu0 %v652_v2  ;;  %604 = vset.pattern.permute.xlu0 %v652_v2  ;;  %v32_v5 = vld [vmem:[%s844_s2 + $0x10] sm:$0xf] }
   0x2   :  { %73 = vmatprep.subr.bf16.mxu0 %v611_v0  ;;  %v614_v3 = vld [vmem:[%s843_s1] sm:$0xff]   ;;  %605 = vset.pattern.permute.xlu1 %v652_v2 }
   0x3   :  { %74 = vmatpush1.bf16.msra.mxu0 %v613_v1  ;;  %v30_v4 = vld [vmem:[%s844_s2] sm:$0xff]  ;;  %45 = vperm.xlu1 %605, %v32_v5  }
   0x4   :  { %35 = vperm.xlu0 %604, %v30_v4  }
   0x5   :  { %11 = vsyncpa [#allocation3], 0  ;;  %v31_v6 = vld [vmem:[%s844_s2 + $0x8] sm:$0xff]  ;;  %v170_v8 = vld [vmem:[%s845_s3 + $0x80] sm:$0xff]  ;;  %vm130_vm1 = vcmask 1043456   ;;  %s654_s18 = smov 126  }
   0x6   :  { %501 = vmatmul.mubr.msk.bf16.vlgmr.msra.gmra.mrb[0].mxu0 %vm66_vm0, %v614_v3  ;;  %v615_v7 = vld [vmem:[%s843_s1 + $0x8] ss:$0 sps:$4 sm:$0x33]   ;;  %v154_v10 = vld [vmem:[%s845_s3] sm:$0xff]  ;;  %v172_v13 = vld [vmem:[%s845_s3 + $0x90] sm:$0xff]  ;;  %vm301_vm2 = vcmask 1041408  }
   0x7   :  { %115 = vmatprep.mubr.bf16.mxu0 %v652_v2  ;;  %v171_v9 = vld [vmem:[%s845_s3 + $0x88] sm:$0xff]  ;;  %v173_v14 = vld [vmem:[%s845_s3 + $0x98] sm:$0xff]  ;;  %v156_v17 = vld [vmem:[%s845_s3 + $0x10] sm:$0xff]  ;;  %vm314_vm3 = vcmask 1045504   ;;  %vm342_vm4 = vcmask 162816   ;;  %s655_s21 = smov 1  }
   0x8   :  { %40 = vperm.xlu0 %604, %v31_v6   ;;  %v561_v11 = vpack.c.bf16 %v171_v9, %v170_v8  ;;  %v155_v12 = vld [vmem:[%s845_s3 + $0x8] sm:$0xff]  ;;  %v565_v16 = vpack.c.bf16 %v173_v14, %v172_v13  ;;  %v157_v18 = vld [vmem:[%s845_s3 + $0x18] sm:$0xff]  ;;  %v174_v19 = vld [vmem:[%s845_s3 + $0xa0] sm:$0xff]  ;;  %vm336_vm5 = vcmask 7168   ;;  %vm435_vm8 = vcmask 1042432   ;;  %s640_s30 = scalar_lea.hbm %s848_s6, 16 }
   0x9   :  { %v563_v15 = vpack.c.bf16 %v155_v12, %v154_v10  ;;  %v175_v20 = vld [vmem:[%s845_s3 + $0xa8] sm:$0xff]  ;;  %v567_v21 = vpack.c.bf16 %v157_v18, %v156_v17  ;;  %v158_v23 = vld [vmem:[%s845_s3 + $0x20] sm:$0xff]  ;;  %v176_v25 = vld [vmem:[%s845_s3 + $0xb0] sm:$0xff]  ;;  %vm470_vm11 = vcmask 12288   ;;  %p641_p0 = scmp.ne.s32.totalorder %s848_s6, %s640_s30  ;;  %p644_p1 = scmp.lt.u32.totalorder %s640_s30, %s848_s6 }
   0xa   :  { %562 = vmatprep.subr.bf16.mxu1 %v561_v11  ;;  %v569_v22 = vpack.c.bf16 %v175_v20, %v174_v19  ;;  %v159_v24 = vld [vmem:[%s845_s3 + $0x28] sm:$0xff]  ;;  %v177_v26 = vld [vmem:[%s845_s3 + $0xb8] sm:$0xff]  ;;  %v160_v29 = vld [vmem:[%s845_s3 + $0x30] sm:$0xff] }
   0xb   :  { %564 = vmatpush3.bf16.msra.mxu1 %v563_v15  ;;  %v571_v27 = vpack.c.bf16 %v159_v24, %v158_v23  ;;  %v573_v28 = vpack.c.bf16 %v177_v26, %v176_v25  ;;  %v161_v30 = vld [vmem:[%s845_s3 + $0x38] sm:$0xff]  ;;  %v178_v54 = vld [vmem:[%s845_s3 + $0xc0] sm:$0xff]  ;;  %v179_v55 = vld [vmem:[%s845_s3 + $0xc8] sm:$0xff]  ;;  %p646_p2 = pnand %p644_p1, %p641_p0 }
   0xc   :  { %566 = vmatprep.subr.bf16.mxu1 %v565_v16  ;;  %v575_v31 = vpack.c.bf16 %v161_v30, %v160_v29  ;;  %v577_v56 = vpack.c.bf16 %v179_v55, %v178_v54  ;;  %v162_v57 = vld [vmem:[%s845_s3 + $0x40] sm:$0xff]  ;;  %v163_v58 = vld [vmem:[%s845_s3 + $0x48] sm:$0xff]  ;;  %v180_v60 = vld [vmem:[%s845_s3 + $0xd0] sm:$0xff] }
   0xd   :  { %v579_v59 = vpack.c.bf16 %v163_v58, %v162_v57  ;;  %v181_v61 = vld [vmem:[%s845_s3 + $0xd8] sm:$0xff]  ;;  %v164_v63 = vld [vmem:[%s845_s3 + $0x50] sm:$0xff]  ;;  %v182_v2 = vld [vmem:[%s845_s3 + $0xe0] sm:$0xff] }
   0xe   :  { %502 = vmatmul.mubr.msk.bf16.gmra.mrb[4].mxu0 %vm66_vm0, %v615_v7  ;;  %v581_v62 = vpack.c.bf16 %v181_v61, %v180_v60  ;;  %v165_v0 = vld [vmem:[%s845_s3 + $0x58] sm:$0xff]  ;;  %v183_v3 = vld [vmem:[%s845_s3 + $0xe8] sm:$0xff]  ;;  %v166_v5 = vld [vmem:[%s845_s3 + $0x60] sm:$0xff] }
   0xf   :  { %568 = vmatpush3.bf16.msra.mxu1 %v567_v21  ;;  %v583_v1 = vpack.c.bf16 %v165_v0, %v164_v63  ;;  %v585_v4 = vpack.c.bf16 %v183_v3, %v182_v2  ;;  %v167_v6 = vld [vmem:[%s845_s3 + $0x68] sm:$0xff]  ;;  %v184_v8 = vld [vmem:[%s845_s3 + $0xf0] sm:$0xff]  ;;  %v185_v9 = vld [vmem:[%s845_s3 + $0xf8] sm:$0xff] }
  0x10   :  { %570 = vmatprep.subr.bf16.mxu1 %v569_v22  ;;  %v587_v7 = vpack.c.bf16 %v167_v6, %v166_v5  ;;  %v589_v10 = vpack.c.bf16 %v185_v9, %v184_v8  ;;  %v168_v11 = vld [vmem:[%s845_s3 + $0x70] sm:$0xff]  ;;  %v169_v12 = vld [vmem:[%s845_s3 + $0x78] sm:$0xff]  ;;  %s653_s3 = smov 127   ;;  %v340_v2 = vld [vmem:[%s846_s4] sm:$0xff] }
  0x11   :  { %v591_v13 = vpack.c.bf16 %v169_v12, %v168_v11  ;;  %558 = vmatprep.mubr.msk.f32.mxu0 %vm342_vm4, %v340_v2 }
  0x13   :  { %572 = vmatpush3.bf16.msra.mxu1 %v571_v27 }
  0x14   :  { %574 = vmatprep.subr.bf16.mxu1 %v573_v28 }
  0x17   :  { %576 = vmatpush3.bf16.msra.mxu1 %v575_v31 }
  0x18   :  { %578 = vmatprep.subr.bf16.mxu1 %v577_v56 }
  0x1b   :  { %580 = vmatpush3.bf16.msra.mxu1 %v579_v59 }
  0x1c   :  { %582 = vmatprep.subr.bf16.mxu1 %v581_v62 }
  0x1f   :  { %584 = vmatpush3.bf16.msra.mxu1 %v583_v1 }
  0x20   :  { %586 = vmatprep.subr.bf16.mxu1 %v585_v4 }
  0x23   :  { %588 = vmatpush3.bf16.msra.mxu1 %v587_v7 }
  0x24   :  { %590 = vmatprep.subr.bf16.mxu1 %v589_v10 }
  0x27   :  { %592 = vmatpush3.bf16.msra.mxu1 %v591_v13 }
  0x82   :  { %v46_v44 = vpop.permute.xlu1 %45 }
  0x83   :  { %v36_v32 = vpop.permute.xlu0 %35 }
  0x87   :  { %v41_v34 = vpop.permute.xlu0 %40 }
  0xd9   :  { %v107_v33 = vpop.f32.mrb[0].mxu0 }
  0xda   :  { %v108_v35 = vadd.f32 %v107_v33, %v36_v32  ;;  %v109_v36 = vpop.f32.mrb[1].mxu0 }
  0xdb   :  { %v110_v37 = vadd.f32 %v109_v36, %v36_v32  ;;  %v111_v38 = vpop.f32.mrb[2].mxu0 }
  0xdc   :  { %v112_v39 = vadd.f32 %v111_v38, %v41_v34  ;;  %v113_v40 = vpop.f32.mrb[3].mxu0 }
  0xdd   :  { %v114_v41 = vadd.f32 %v113_v40, %v41_v34  ;;  %v124_v42 = vmax.f32 %v108_v35, %v110_v37 }
  0xdf   :  { %125 = vmax.xlane.f32.xlu1 %v124_v42  ;;  %v127_v43 = vmax.f32 %v112_v39, %v114_v41 }
  0xe1   :  { %v117_v45 = vpop.f32.mrb[4].mxu0  ;;  %128 = vmax.xlane.f32.xlu0 %v127_v43 }
  0xe2   :  { %v118_v46 = vadd.f32 %v117_v45, %v46_v44  ;;  %v119_v47 = vpop.f32.mrb[5].mxu0 }
  0xe3   :  { %v120_v48 = vadd.f32 %v119_v47, %v46_v44  ;;  %v121_v49 = vpop.f32.mrb[6].mxu0 }
  0xe4   :  { %v131_v50 = vsel %vm130_vm1, %v118_v46, -inf  ;;  %v122_v51 = vpop.f32.mrb[7].mxu0 }
  0xe5   :  { %v132_v52 = vsel %vm130_vm1, %v120_v48, -inf }
  0xe6   :  { %v133_v53 = vmax.f32 %v131_v50, %v132_v52 }
  0xe8   :  { %134 = vmax.xlane.f32.xlu0 %v133_v53 }
 0x16c   :  { %v126_v14 = vpop.xlane.xlu1 %125 }
 0x16d   :  { %v136_v15 = vsub.f32 %v108_v35, %v126_v14  ;;  %v137_v16 = vsub.f32 %v110_v37, %v126_v14 }
 0x16e   :  { %v129_v17 = vpop.xlane.xlu0 %128 }
 0x16f   :  { %v142_v18 = vmul.f32 1.442695, %v136_v15  ;;  %v144_v19 = vmul.f32 1.442695, %v137_v16  ;;  %v138_v20 = vsub.f32 %v112_v39, %v129_v17  ;;  %v139_v21 = vsub.f32 %v114_v41, %v129_v17 }
 0x171   :  { %616 = vpow2.f32 %v142_v18  ;;  %v148_v22 = vmul.f32 1.442695, %v139_v21  ;;  %v146_v23 = vmul.f32 1.442695, %v138_v20  ;;  %v341_v20 = vld [vmem:[%s846_s4 + $0x8] sm:$0x3] }
 0x172   :  { %618 = vpow2.f32 %v144_v19  ;;  %v427_v21 = vld [vmem:[%s847_s5] sm:$0xff] }
 0x173   :  { %620 = vpow2.f32 %v148_v22  ;;  %v449_v22 = vrot.slane %v427_v21, 1 }
 0x174   :  { %622 = vpow2.f32 %v146_v23 }
 0x175   :  { %v135_v24 = vpop.xlane.xlu0 %134  ;;  %v451_v23 = vsub.f32 %v427_v21, %v449_v22 }
 0x176   :  { %v140_v25 = vsub.f32 %v118_v46, %v135_v24  ;;  %v141_v26 = vsub.f32 %v120_v48, %v135_v24 }
 0x177   :  { %v452_v24 = vmul.f32 %v451_v23, %v451_v23 }
 0x178   :  { %v150_v27 = vmul.f32 1.442695, %v140_v25  ;;  %v152_v28 = vmul.f32 1.442695, %v141_v26 }
 0x179   :  { %v454_v25 = vrot.slane %v452_v24, 5 }
 0x17a   :  { %624 = vpow2.f32 %v150_v27 }
 0x17b   :  { %v617_v29 = vpop.eup %616  ;;  %626 = vpow2.f32 %v152_v28  ;;  %v456_v26 = vadd.f32 %v454_v25, %v452_v24  ;;  %v428_v28 = vld [vmem:[%s847_s5 + $0x8] sm:$0x3] }
 0x17c   :  { %v619_v30 = vpop.eup %618 }
 0x17d   :  { %250 = vmatprep.mubr.f32.mxu1 %v619_v30  ;;  %v621_v31 = vpop.eup %620  ;;  %vm459_vm6 = vcmp.eq.f32.partialorder %v456_v26, inf  ;;  %vm461_vm7 = vcmp.eq.f32.partialorder %v456_v26, 0.0 }
 0x17e   :  { %251 = vmatmul.mubr.f32.vlgmr.msra.gmra.mrb[0].mxu1 %v617_v29  ;;  %v623_v32 = vpop.eup %622 }
 0x17f   :  { %255 = vmatprep.mubr.f32.mxu1 %v621_v31 }
 0x182   :  { %256 = vmatmul.mubr.f32.gmra.mrb[2].mxu1 %v623_v32 }
 0x184   :  { %v625_v33 = vpop.eup %624 }
 0x185   :  { %v627_v34 = vpop.eup %626 }
 0x186   :  { %260 = vmatprep.mubr.f32.mxu1 %v627_v34  ;;  %v462_v34 = vand.u32 2147483648, %v456_v26 }
 0x187   :  { %261 = vmatmul.mubr.f32.gmra.mrb[4].mxu1 %v625_v33 }
 0x251   :  { %v538_v35 = vpop.f32.mrb[0].mxu1 }
 0x252   :  { %v539_v36 = vpop.f32.mrb[1].mxu1 }
 0x253   :  { %v540_v37 = vadd.f32 %v539_v36, %v538_v35 }
 0x255   :  { %v541_v38 = vpop.f32.mrb[2].mxu1 }
 0x256   :  { %v542_v39 = vpop.f32.mrb[3].mxu1 }
 0x257   :  { %v543_v40 = vadd.f32 %v542_v39, %v541_v38 }
 0x259   :  { %628 = vrcp.f32 %v543_v40 }
 0x25a   :  { %v544_v41 = vpop.f32.mrb[4].mxu1 }
 0x25b   :  { %v545_v42 = vpop.f32.mrb[5].mxu1 }
 0x25c   :  { %v546_v43 = vadd.f32 %v545_v42, %v544_v41 }
 0x25e   :  { %630 = vrcp.f32 %v546_v43 }
 0x25f   :  { %632 = vrcp.f32 %v540_v37 }
 0x260   :  { %634 = vrsqrt.f32 %v456_v26 }
 0x263   :  { %v629_v44 = vpop.eup %628 }
 0x264   :  { %v270_v45 = vmul.f32 16.0, %v629_v44 }
 0x266   :  { %289 = vrot.lane.b32.xlu1 %v270_v45, %s653_s3 }
 0x268   :  { %v631_v46 = vpop.eup %630 }
 0x269   :  { %v271_v47 = vmul.f32 16.0, %v631_v46  ;;  %v633_v48 = vpop.eup %632 }
 0x26a   :  { %277 = vrot.lane.b32.xlu1 %v270_v45, %s654_s18  ;;  %v269_v49 = vmul.f32 16.0, %v633_v48  ;;  %v635_v27 = vpop.eup %634 }
 0x26b   :  { %291 = vrot.lane.b32.xlu0 %v271_v47, %s653_s3  ;;  %v458_v29 = vmul.f32 %v635_v27, %v456_v26 }
 0x26d   :  { %v460_v36 = vsel %vm459_vm6, %v456_v26, %v458_v29 }
 0x26e   :  { %279 = vrot.lane.b32.xlu1 %v271_v47, %s654_s18 }
 0x26f   :  { %287 = vrot.lane.b32.xlu0 %v269_v49, %s653_s3 }
 0x2d8   :  { %v290_v50 = vpop.permute.xlu1 %289 }
 0x2d9   :  { %v297_v51 = vmul.f32 %v543_v40, %v290_v50 }
 0x2db   :  { %320 = vrot.lane.b32.xlu1 %v297_v51, %s653_s3  ;;  %v303_v57 = vrot.slane %v297_v51, 6 }
 0x2dc   :  { %v278_v59 = vpop.permute.xlu1 %277 }
 0x2dd   :  { %v292_v52 = vpop.permute.xlu0 %291  ;;  %v285_v62 = vmul.f32 %v543_v40, %v278_v59  ;;  %v463_v40 = vsel %vm461_vm7, %v462_v34, %v460_v36 }
 0x2de   :  { %v298_v53 = vmul.f32 %v546_v43, %v292_v52  ;;  %636 = vrcp.f32 %v463_v40 }
 0x2df   :  { %275 = vrot.lane.b32.xlu1 %v269_v49, %s654_s18  ;;  %v315_v0 = vrot.slane %v285_v62, 2 }
 0x2e0   :  { %322 = vrot.lane.b32.xlu0 %v298_v53, %s653_s3  ;;  %v280_v60 = vpop.permute.xlu1 %279 }
 0x2e1   :  { %v288_v54 = vpop.permute.xlu0 %287  ;;  %v286_v61 = vmul.f32 %v546_v43, %v280_v60  ;;  %v465_v43 = vlaneseq }
 0x2e2   :  { %v296_v55 = vmul.f32 %v540_v37, %v288_v54 }
 0x2e3   :  { %v316_v63 = vrot.slane %v286_v61, 2  ;;  %v466_v44 = vshrl.u32 %v465_v43, 7 }
 0x2e4   :  { %v302_v56 = vrot.slane %v296_v55, 6 }
 0x2e5   :  { %v317_v3 = vsel %vm314_vm3, %v315_v0, %v316_v63  ;;  %v467_v45 = vsub.s32 0, %v466_v44 }
 0x2e6   :  { %305 = vrot.lane.b32.xlu0 %v302_v56, %s653_s3  ;;  %v304_v58 = vsel %vm301_vm2, %v302_v56, %v303_v57 }
 0x2e8   :  { %v637_v46 = vpop.eup %636 }
 0x2e9   :  { %v468_v49 = vrot.slane %v637_v46, %v467_v45 }
 0x2ea   :  { %307 = vrot.lane.b32.xlu0 %v304_v58, %s653_s3 }
 0x34d   :  { %v321_v1 = vpop.permute.xlu1 %320 }
 0x34e   :  { %v325_v4 = vsel %vm301_vm2, %v316_v63, %v321_v1 }
 0x34f   :  { %v606_v5 = vpack.i.bf16 %v325_v4, %v317_v3 }
 0x351   :  { %607 = vrot.lane.b32.xlu1 %v606_v5, %s655_s21  ;;  %v276_v7 = vpop.permute.xlu1 %275 }
 0x352   :  { %v323_v6 = vpop.permute.xlu0 %322  ;;  %v284_v10 = vmul.f32 %v540_v37, %v276_v7 }
 0x355   :  { %331 = vrot.lane.b32.xlu1 %v323_v6, %s655_s21 }
 0x358   :  { %v306_v8 = vpop.permute.xlu0 %305 }
 0x359   :  { %v311_v13 = vsel %vm301_vm2, %v285_v62, %v306_v8 }
 0x35c   :  { %v308_v18 = vpop.permute.xlu0 %307 }
 0x3c3   :  { %v608_v9 = vpop.permute.xlu1 %607 }
 0x3c4   :  { %v610_v11 = vunpack.i.h.bf16 %v608_v9  ;;  %v609_v12 = vunpack.i.l.bf16 %v608_v9 }
 0x3c6   :  { %v337_v14 = vsel %vm336_vm5, %v284_v10, %v609_v12  ;;  %v338_v15 = vsel %vm336_vm5, %v311_v13, %v610_v11 }
 0x3c7   :  { %v332_v16 = vpop.permute.xlu1 %331  ;;  %v593_v17 = vpack.c.bf16 %v338_v15, %v337_v14 }
 0x3c8   :  { %v339_v19 = vsel %vm336_vm5, %v308_v18, %v332_v16 }
 0x3c9   :  { %594 = vmatprep.subr.bf16.mxu0 %v593_v17 }
 0x3ca   :  { %596 = vmatpush3.bf16.msra.mxu0 %v593_v17 }
 0x3cb   :  { %556 = vmatprep.subr.msk.mxu0 %vm130_vm1, %v339_v19 }
 0x3ce   :  { %557 = vmatpush3.msk.msra.mxu0 %vm130_vm1, %v339_v19 }
 0x3cf   :  { %559 = vmatmul.mubr.msk.f32.vlgmr.msra.gmra.mrb[8].mxu0 %vm342_vm4, %v341_v20 }
 0x4a2   :  { %v560_v30 = vpop.f32.mrb[8].mxu0 }
 0x4a3   :  { %v430_v31 = vsub.f32 %v428_v28, %v560_v30  ;;  %v418_v32 = vpop.f32.mrb[9].mxu0 }
 0x4a4   :  { %v429_v33 = vsub.f32 %v427_v21, %v418_v32 }
 0x4a5   :  { %v432_v35 = vmul.f32 %v430_v31, %v430_v31 }
 0x4a6   :  { %v431_v37 = vmul.f32 %v429_v33, %v429_v33 }
 0x4a7   :  { %v437_v38 = vrot.slane %v432_v35, 5 }
 0x4a8   :  { %v436_v39 = vrot.slane %v431_v37, 5 }
 0x4aa   :  { %v438_v41 = vsel %vm435_vm8, %v436_v39, %v437_v38 }
 0x4ab   :  { %v440_v42 = vadd.f32 %v438_v41, %v431_v37 }
 0x4ad   :  { %638 = vrsqrt.f32 %v440_v42  ;;  %vm443_vm9 = vcmp.eq.f32.partialorder %v440_v42, inf  ;;  %v446_v50 = vand.u32 2147483648, %v440_v42  ;;  %vm445_vm10 = vcmp.eq.f32.partialorder %v440_v42, 0.0 }
 0x4b7   :  { %v639_v47 = vpop.eup %638 }
 0x4b8   :  { %v442_v48 = vmul.f32 %v639_v47, %v440_v42 }
 0x4ba   :  { %v444_v51 = vsel %vm443_vm9, %v440_v42, %v442_v48 }
 0x4bb   :  { %v447_v52 = vsel %vm445_vm10, %v446_v50, %v444_v51 }
 0x4bc   :  { %v469_v53 = vmul.f32 %v468_v49, %v447_v52 }
 0x4be   :  { %v471_v54 = vsel %vm470_vm11, %v469_v53, 0.0 }
 0x4bf   :  { %472 = vadd.xlane.f32.xlu0 %v471_v54 }
 0x54c   :  { %v473_v55 = vpop.xlane.xlu0 %472 }
 0x54d   :  { %v474_v56 = vrot.slane %v473_v55, 4 }
 0x54f   :  { %v475_v57 = vadd.f32 %v474_v56, %v473_v55 }
 0x551   :  { %v476_v58 = vrot.slane %v475_v57, 2 }
 0x553   :  { %v477_v59 = vadd.f32 %v476_v58, %v475_v57 }
 0x555   :  { %v478_v60 = vrot.slane %v477_v59, 1 }
 0x557   :  { %v479_v61 = vadd.f32 %v478_v60, %v477_v59 }
 0x559   :  { %597 = vpush %v479_v61 }
 0x58a   :  { %s598_s4 = spop %597 }
 0x58b   :  { %s481_s5 = smul.f32 0.1, %s598_s4 }
 0x58d   :  { %483 = sst [smem:[#allocation2]] %s481_s5 }
 0x58e   :  { %649 = shalt.err (!%p646_p2)
}
 0x58f   :  { %s656_s10 = smov [#allocation2]  }
 0x590   :  { %491 = dma.smem_to_hbm %s656_s10, 16, %s848_s6, [#allocation3]  }
 0x591   :  { %650 = dma.done.wait [#allocation3], 16  }
 0x592   :  { %651 = vsyncadd [#allocation3], 4294967280 }
 0x593   :  { %495 = sfence }
 0x594   :  { %496 = vsyncpa [#allocation3], 1 }

</bundles_post_ra>
